<compile_context>
chip_gen: v7x
topology: tpu7x:2x2x1
jax: 0.10.0
libtpu: 0.0.40
codegen_flags: <defaults>
</compile_context>

<pallas_src>
import functools

import jax
import jax.numpy as jnp
from jax.experimental import pallas as pl
from jax.experimental.pallas import tpu as pltpu

DILATIONS = (1, 3, 5)
KSIZE = 3


def _leaky(v):
    return jnp.where(v > 0, v, 0.1 * v)


def resblock_kernel(x_ref, w1_ref, b1_ref, w2_ref, b2_ref, o_ref,
                    *, dilations, ksize, halo, t_tile, t_real):
    # x_ref block: (1, 1, C, TW) f32 window (TW = t_tile + 2*halo)
    # w*_ref:      (S, C, K*C) bf16 (taps flattened into the contraction axis)
    # b*_ref:      (S, C, 1)   f32
    # o_ref block: (1, C, t_tile) f32
    j = pl.program_id(1)
    x = x_ref[0, 0]                       # (C, TW) f32
    C, TW = x.shape

    # Hoisted once per window: mask of columns that lie inside the real
    # sequence [0, t_real).  Forcing conv outputs to zero there reproduces
    # PyTorch's per-conv zero padding at the true sequence boundaries.
    t_glob = jax.lax.broadcasted_iota(jnp.int32, (C, TW), 1) + (j * t_tile - halo)
    valid = (t_glob >= 0) & (t_glob < t_real)

    def conv(v, w_flat, b, dil):
        # v: (C, TW) f32; w_flat: (C, K*C) bf16; b: (C, 1) f32
        pad = (ksize * dil - dil) // 2
        parts = []
        for k in range(ksize):
            off = k * dil - pad           # static Python int in {-d, 0, +d}
            if off == 0:
                parts.append(v)
            else:
                # Window-edge wrap lands only in the halo region and never
                # reaches the stored interior (halo == total receptive field).
                parts.append(pltpu.roll(v, shift=(-off) % TW, axis=1))
        rhs = jnp.concatenate(parts, axis=0).astype(jnp.bfloat16)   # (K*C, TW)
        out = jnp.dot(w_flat, rhs, preferred_element_type=jnp.float32)
        return jnp.where(valid, out + b, 0.0)

    for s, d in enumerate(dilations):
        xt = _leaky(x)
        xt = conv(xt, w1_ref[s], b1_ref[s], d)
        xt = _leaky(xt)
        xt = conv(xt, w2_ref[s], b2_ref[s], 1)
        x = x + xt

    o_ref[0] = x[:, halo:halo + t_tile]


def resblock_pallas(x, w1, b1, w2, b2, *, t_tile=512):
    """x: (N, C, T) f32; w1/w2: (S, K, C_out, C_in) f32; b1/b2: (S, C, 1) f32."""
    N, C, T = x.shape
    S, K, _, _ = w1.shape

    # Total receptive-field half-width of the fused block (halo per side).
    halo = sum(((K - 1) // 2) * (d + 1) for d in DILATIONS)

    # Time tile: multiple of 128 lanes, no larger than the (rounded-up) seq.
    tt = max(128, (t_tile // 128) * 128)
    tt = min(tt, -(-T // 128) * 128)
    t_pad = -(-T // tt) * tt
    n_t = t_pad // tt
    tw = tt + 2 * halo

    # Halo-ed overlapping windows, built once in the wrapper (small duplication,
    # keeps the kernel's BlockSpecs plain/blocked and fully pipelined).
    xp = jnp.pad(x, ((0, 0), (0, 0), (halo, halo + t_pad - T)))
    win = (jnp.arange(n_t) * tt)[:, None] + jnp.arange(tw)[None, :]   # (n_t, tw)
    x_win = jnp.transpose(xp[:, :, win], (0, 2, 1, 3))                # (N, n_t, C, tw)

    # Flatten taps into the contraction axis and pre-cast to bf16 (MXU native).
    w1f = jnp.transpose(w1, (0, 2, 1, 3)).reshape(S, C, K * C).astype(jnp.bfloat16)
    w2f = jnp.transpose(w2, (0, 2, 1, 3)).reshape(S, C, K * C).astype(jnp.bfloat16)

    # VMEM budget: double-buffered x/out blocks + single-copy weights/biases,
    # with headroom for in-kernel temporaries.
    vmem_bytes = (2 * C * tw * 4 + 2 * C * tt * 4
                  + 2 * S * C * K * C * 2 + 2 * S * C * 128 * 4)
    vmem_limit = int(min(max(4 * vmem_bytes + (8 << 20), 32 << 20), 64 << 20))

    kern = functools.partial(resblock_kernel, dilations=DILATIONS, ksize=K,
                             halo=halo, t_tile=tt, t_real=T)

    # Weights/biases: one resident VMEM copy, not pipelined/double-buffered.
    resident = pl.BlockSpec(memory_space=pltpu.MemorySpace.VMEM)

    out = pl.pallas_call(
        kern,
        out_shape=jax.ShapeDtypeStruct((N, C, t_pad), jnp.float32),
        grid_spec=pltpu.PrefetchScalarGridSpec(
            num_scalar_prefetch=0,
            grid=(N, n_t),
            in_specs=[
                pl.BlockSpec((1, 1, C, tw), lambda n, j: (n, j, 0, 0)),
                resident,   # w1f
                resident,   # b1
                resident,   # w2f
                resident,   # b2
            ],
            out_specs=pl.BlockSpec((1, C, tt), lambda n, j: (n, 0, j)),
        ),
        compiler_params=pltpu.CompilerParams(
            dimension_semantics=("parallel", "parallel"),
            vmem_limit_bytes=vmem_limit),
    )(x_win, w1f, b1, w2f, b2)
    return out[:, :, :T]


# ---------------- pure-JAX reference (for verification) ----------------
def _conv_ref(x, w, b, dil):
    # x: (N, C, T); w: (K, C_out, C_in); b: (C, 1)
    wk = jnp.transpose(w, (1, 2, 0))                     # (C_out, C_in, K)
    pad = (w.shape[0] * dil - dil) // 2
    y = jax.lax.conv_general_dilated(
        x, wk, window_strides=(1,), padding=[(pad, pad)],
        rhs_dilation=(dil,), dimension_numbers=("NCH", "OIH", "NCH"))
    return y + b[None, :, :]


def resblock_ref(x, w1, b1, w2, b2):
    for s, d in enumerate(DILATIONS):
        xt = _leaky(x)
        xt = _conv_ref(xt, w1[s], b1[s], d)
        xt = _leaky(xt)
        xt = _conv_ref(xt, w2[s], b2[s], 1)
        x = xt + x
    return x


if __name__ == "__main__":
    S = len(DILATIONS)
    key = jax.random.PRNGKey(0)
    kx, kw1, kb1, kw2, kb2, kx2 = jax.random.split(key, 6)

    N, C, T = 2, 16, 64
    x = jax.random.normal(kx, (N, C, T), dtype=jnp.float32)
    # Weights (stage, tap, C_out, C_in) ~ N(0, 0.01) like init_weights.
    w1 = 0.01 * jax.random.normal(kw1, (S, KSIZE, C, C), dtype=jnp.float32)
    w2 = 0.01 * jax.random.normal(kw2, (S, KSIZE, C, C), dtype=jnp.float32)
    b1 = 0.01 * jax.random.normal(kb1, (S, C, 1), dtype=jnp.float32)
    b2 = 0.01 * jax.random.normal(kb2, (S, C, 1), dtype=jnp.float32)

    # Case 1: single time tile.
    out = jax.block_until_ready(resblock_pallas(x, w1, b1, w2, b2))
    ref = resblock_ref(x, w1, b1, w2, b2)
    assert out.shape == (N, C, T) and out.dtype == jnp.float32
    err = jnp.max(jnp.abs(out - ref))
    assert jnp.allclose(out, ref, atol=2e-2, rtol=2e-2), f"max abs err {err}"

    # Case 2: multiple time tiles + T not a multiple of the tile (halo path).
    T2 = 400
    x2 = jax.random.normal(kx2, (N, C, T2), dtype=jnp.float32)
    out2 = jax.block_until_ready(resblock_pallas(x2, w1, b1, w2, b2, t_tile=128))
    ref2 = resblock_ref(x2, w1, b1, w2, b2)
    assert out2.shape == (N, C, T2) and out2.dtype == jnp.float32
    err2 = jnp.max(jnp.abs(out2 - ref2))
    assert jnp.allclose(out2, ref2, atol=2e-2, rtol=2e-2), f"max abs err {err2}"

    print("KERNEL_OK")
</pallas_src>

<mosaic_0001>
module attributes {stable_mosaic.version = 11 : i64} {
  func.func @resblock_kernel(%arg0: i32, %arg1: i32, %arg2: memref<1x1x16x152xf32, #tpu.memory_space<vmem>>, %arg3: memref<3x16x48xbf16, #tpu.memory_space<vmem>>, %arg4: memref<3x16x1xf32, #tpu.memory_space<vmem>>, %arg5: memref<3x16x48xbf16, #tpu.memory_space<vmem>>, %arg6: memref<3x16x1xf32, #tpu.memory_space<vmem>>, %arg7: memref<1x16x128xf32, #tpu.memory_space<vmem>>) attributes {dimension_semantics = [#tpu.dimension_semantics<parallel>, #tpu.dimension_semantics<parallel>], iteration_bounds = array<i64: 2, 1>, scalar_prefetch = 0 : i64, scratch_operands = 0 : i64, tpu.core_type = #tpu.core_type<tc>, window_params = [{transform_indices = @transform_0, window_bounds = array<i64: 1, 1, 16, 152>}, {pipeline_mode = #tpu.pipeline_mode<synchronous>, transform_indices = @transform_1, window_bounds = array<i64: 3, 16, 48>}, {pipeline_mode = #tpu.pipeline_mode<synchronous>, transform_indices = @transform_2, window_bounds = array<i64: 3, 16, 1>}, {pipeline_mode = #tpu.pipeline_mode<synchronous>, transform_indices = @transform_3, window_bounds = array<i64: 3, 16, 48>}, {pipeline_mode = #tpu.pipeline_mode<synchronous>, transform_indices = @transform_4, window_bounds = array<i64: 3, 16, 1>}, {transform_indices = @transform_5, window_bounds = array<i64: 1, 16, 128>}]} {
    %c0 = arith.constant 0 : index
    %c0_0 = arith.constant 0 : index
    %c0_1 = arith.constant 0 : index
    %c0_2 = arith.constant 0 : index
    %0 = vector.load %arg2[%c0, %c0_0, %c0_1, %c0_2] : memref<1x1x16x152xf32, #tpu.memory_space<vmem>>, vector<1x1x16x152xf32>
    %1 = vector.shape_cast %0 : vector<1x1x16x152xf32> to vector<16x152xf32>
    %2 = tpu.iota {dimensions = array<i32: 1>} : vector<16x152xi32>
    %c128_i32 = arith.constant 128 : i32
    %3 = arith.muli %arg1, %c128_i32 : i32
    %c12_i32 = arith.constant 12 : i32
    %4 = arith.subi %3, %c12_i32 : i32
    %5 = vector.broadcast %4 : i32 to vector<16x152xi32>
    %6 = arith.addi %2, %5 : vector<16x152xi32>
    %c0_i32 = arith.constant 0 : i32
    %7 = vector.broadcast %c0_i32 : i32 to vector<16x152xi32>
    %8 = arith.cmpi sge, %6, %7 : vector<16x152xi32>
    %c64_i32 = arith.constant 64 : i32
    %9 = vector.broadcast %c64_i32 : i32 to vector<16x152xi32>
    %10 = arith.cmpi slt, %6, %9 : vector<16x152xi32>
    %11 = arith.andi %8, %10 : vector<16x152xi1>
    %cst = arith.constant 0.000000e+00 : f32
    %12 = vector.broadcast %cst : f32 to vector<16x152xf32>
    %13 = arith.cmpf ogt, %1, %12 : vector<16x152xf32>
    %cst_3 = arith.constant 1.000000e-01 : f32
    %14 = vector.broadcast %cst_3 : f32 to vector<16x152xf32>
    %15 = arith.mulf %14, %1 : vector<16x152xf32>
    %16 = arith.select %13, %1, %15 : vector<16x152xi1>, vector<16x152xf32>
    %c0_4 = arith.constant 0 : index
    %c0_5 = arith.constant 0 : index
    %c0_6 = arith.constant 0 : index
    %17 = vector.load %arg3[%c0_4, %c0_5, %c0_6] : memref<3x16x48xbf16, #tpu.memory_space<vmem>>, vector<1x16x48xbf16>
    %18 = vector.shape_cast %17 : vector<1x16x48xbf16> to vector<16x48xbf16>
    %c0_7 = arith.constant 0 : index
    %c0_8 = arith.constant 0 : index
    %c0_9 = arith.constant 0 : index
    %19 = vector.load %arg4[%c0_7, %c0_8, %c0_9] : memref<3x16x1xf32, #tpu.memory_space<vmem>>, vector<1x16x1xf32>
    %20 = vector.shape_cast %19 : vector<1x16x1xf32> to vector<16x1xf32>
    %c1_i32 = arith.constant 1 : i32
    %21 = tpu.dynamic_rotate %16 by %c1_i32 dim 1 : vector<16x152xf32>, i32 -> vector<16x152xf32>
    %c151_i32 = arith.constant 151 : i32
    %22 = tpu.dynamic_rotate %16 by %c151_i32 dim 1 : vector<16x152xf32>, i32 -> vector<16x152xf32>
    %23 = tpu.concatenate %21, %16, %22 in 0 : vector<16x152xf32>, vector<16x152xf32>, vector<16x152xf32> -> vector<48x152xf32>
    %24 = arith.truncf %23 : vector<48x152xf32> to vector<48x152xbf16>
    %cst_10 = arith.constant dense<0.000000e+00> : vector<16x152xf32>
    %25 = tpu.matmul %18, %24, %cst_10 {dimension_numbers = #tpu.dot_dimension_numbers<[1], [0], [0], [1], [0, 0, 1, 1], [], []>} : vector<16x48xbf16>, vector<48x152xbf16>, vector<16x152xf32> -> vector<16x152xf32>
    %26 = vector.broadcast %20 : vector<16x1xf32> to vector<16x152xf32>
    %27 = arith.addf %25, %26 : vector<16x152xf32>
    %cst_11 = arith.constant 0.000000e+00 : f32
    %28 = vector.broadcast %cst_11 : f32 to vector<16x152xf32>
    %29 = arith.select %11, %27, %28 : vector<16x152xi1>, vector<16x152xf32>
    %cst_12 = arith.constant 0.000000e+00 : f32
    %30 = vector.broadcast %cst_12 : f32 to vector<16x152xf32>
    %31 = arith.cmpf ogt, %29, %30 : vector<16x152xf32>
    %cst_13 = arith.constant 1.000000e-01 : f32
    %32 = vector.broadcast %cst_13 : f32 to vector<16x152xf32>
    %33 = arith.mulf %32, %29 : vector<16x152xf32>
    %34 = arith.select %31, %29, %33 : vector<16x152xi1>, vector<16x152xf32>
    %c0_14 = arith.constant 0 : index
    %c0_15 = arith.constant 0 : index
    %c0_16 = arith.constant 0 : index
    %35 = vector.load %arg5[%c0_14, %c0_15, %c0_16] : memref<3x16x48xbf16, #tpu.memory_space<vmem>>, vector<1x16x48xbf16>
    %36 = vector.shape_cast %35 : vector<1x16x48xbf16> to vector<16x48xbf16>
    %c0_17 = arith.constant 0 : index
    %c0_18 = arith.constant 0 : index
    %c0_19 = arith.constant 0 : index
    %37 = vector.load %arg6[%c0_17, %c0_18, %c0_19] : memref<3x16x1xf32, #tpu.memory_space<vmem>>, vector<1x16x1xf32>
    %38 = vector.shape_cast %37 : vector<1x16x1xf32> to vector<16x1xf32>
    %c1_i32_20 = arith.constant 1 : i32
    %39 = tpu.dynamic_rotate %34 by %c1_i32_20 dim 1 : vector<16x152xf32>, i32 -> vector<16x152xf32>
    %c151_i32_21 = arith.constant 151 : i32
    %40 = tpu.dynamic_rotate %34 by %c151_i32_21 dim 1 : vector<16x152xf32>, i32 -> vector<16x152xf32>
    %41 = tpu.concatenate %39, %34, %40 in 0 : vector<16x152xf32>, vector<16x152xf32>, vector<16x152xf32> -> vector<48x152xf32>
    %42 = arith.truncf %41 : vector<48x152xf32> to vector<48x152xbf16>
    %cst_22 = arith.constant dense<0.000000e+00> : vector<16x152xf32>
    %43 = tpu.matmul %36, %42, %cst_22 {dimension_numbers = #tpu.dot_dimension_numbers<[1], [0], [0], [1], [0, 0, 1, 1], [], []>} : vector<16x48xbf16>, vector<48x152xbf16>, vector<16x152xf32> -> vector<16x152xf32>
    %44 = vector.broadcast %38 : vector<16x1xf32> to vector<16x152xf32>
    %45 = arith.addf %43, %44 : vector<16x152xf32>
    %cst_23 = arith.constant 0.000000e+00 : f32
    %46 = vector.broadcast %cst_23 : f32 to vector<16x152xf32>
    %47 = arith.select %11, %45, %46 : vector<16x152xi1>, vector<16x152xf32>
    %48 = arith.addf %1, %47 : vector<16x152xf32>
    %cst_24 = arith.constant 0.000000e+00 : f32
    %49 = vector.broadcast %cst_24 : f32 to vector<16x152xf32>
    %50 = arith.cmpf ogt, %48, %49 : vector<16x152xf32>
    %cst_25 = arith.constant 1.000000e-01 : f32
    %51 = vector.broadcast %cst_25 : f32 to vector<16x152xf32>
    %52 = arith.mulf %51, %48 : vector<16x152xf32>
    %53 = arith.select %50, %48, %52 : vector<16x152xi1>, vector<16x152xf32>
    %c1 = arith.constant 1 : index
    %c0_26 = arith.constant 0 : index
    %c0_27 = arith.constant 0 : index
    %54 = vector.load %arg3[%c1, %c0_26, %c0_27] : memref<3x16x48xbf16, #tpu.memory_space<vmem>>, vector<1x16x48xbf16>
    %55 = vector.shape_cast %54 : vector<1x16x48xbf16> to vector<16x48xbf16>
    %c1_28 = arith.constant 1 : index
    %c0_29 = arith.constant 0 : index
    %c0_30 = arith.constant 0 : index
    %56 = vector.load %arg4[%c1_28, %c0_29, %c0_30] : memref<3x16x1xf32, #tpu.memory_space<vmem>>, vector<1x16x1xf32>
    %57 = vector.shape_cast %56 : vector<1x16x1xf32> to vector<16x1xf32>
    %c3_i32 = arith.constant 3 : i32
    %58 = tpu.dynamic_rotate %53 by %c3_i32 dim 1 : vector<16x152xf32>, i32 -> vector<16x152xf32>
    %c149_i32 = arith.constant 149 : i32
    %59 = tpu.dynamic_rotate %53 by %c149_i32 dim 1 : vector<16x152xf32>, i32 -> vector<16x152xf32>
    %60 = tpu.concatenate %58, %53, %59 in 0 : vector<16x152xf32>, vector<16x152xf32>, vector<16x152xf32> -> vector<48x152xf32>
    %61 = arith.truncf %60 : vector<48x152xf32> to vector<48x152xbf16>
    %cst_31 = arith.constant dense<0.000000e+00> : vector<16x152xf32>
    %62 = tpu.matmul %55, %61, %cst_31 {dimension_numbers = #tpu.dot_dimension_numbers<[1], [0], [0], [1], [0, 0, 1, 1], [], []>} : vector<16x48xbf16>, vector<48x152xbf16>, vector<16x152xf32> -> vector<16x152xf32>
    %63 = vector.broadcast %57 : vector<16x1xf32> to vector<16x152xf32>
    %64 = arith.addf %62, %63 : vector<16x152xf32>
    %cst_32 = arith.constant 0.000000e+00 : f32
    %65 = vector.broadcast %cst_32 : f32 to vector<16x152xf32>
    %66 = arith.select %11, %64, %65 : vector<16x152xi1>, vector<16x152xf32>
    %cst_33 = arith.constant 0.000000e+00 : f32
    %67 = vector.broadcast %cst_33 : f32 to vector<16x152xf32>
    %68 = arith.cmpf ogt, %66, %67 : vector<16x152xf32>
    %cst_34 = arith.constant 1.000000e-01 : f32
    %69 = vector.broadcast %cst_34 : f32 to vector<16x152xf32>
    %70 = arith.mulf %69, %66 : vector<16x152xf32>
    %71 = arith.select %68, %66, %70 : vector<16x152xi1>, vector<16x152xf32>
    %c1_35 = arith.constant 1 : index
    %c0_36 = arith.constant 0 : index
    %c0_37 = arith.constant 0 : index
    %72 = vector.load %arg5[%c1_35, %c0_36, %c0_37] : memref<3x16x48xbf16, #tpu.memory_space<vmem>>, vector<1x16x48xbf16>
    %73 = vector.shape_cast %72 : vector<1x16x48xbf16> to vector<16x48xbf16>
    %c1_38 = arith.constant 1 : index
    %c0_39 = arith.constant 0 : index
    %c0_40 = arith.constant 0 : index
    %74 = vector.load %arg6[%c1_38, %c0_39, %c0_40] : memref<3x16x1xf32, #tpu.memory_space<vmem>>, vector<1x16x1xf32>
    %75 = vector.shape_cast %74 : vector<1x16x1xf32> to vector<16x1xf32>
    %c1_i32_41 = arith.constant 1 : i32
    %76 = tpu.dynamic_rotate %71 by %c1_i32_41 dim 1 : vector<16x152xf32>, i32 -> vector<16x152xf32>
    %c151_i32_42 = arith.constant 151 : i32
    %77 = tpu.dynamic_rotate %71 by %c151_i32_42 dim 1 : vector<16x152xf32>, i32 -> vector<16x152xf32>
    %78 = tpu.concatenate %76, %71, %77 in 0 : vector<16x152xf32>, vector<16x152xf32>, vector<16x152xf32> -> vector<48x152xf32>
    %79 = arith.truncf %78 : vector<48x152xf32> to vector<48x152xbf16>
    %cst_43 = arith.constant dense<0.000000e+00> : vector<16x152xf32>
    %80 = tpu.matmul %73, %79, %cst_43 {dimension_numbers = #tpu.dot_dimension_numbers<[1], [0], [0], [1], [0, 0, 1, 1], [], []>} : vector<16x48xbf16>, vector<48x152xbf16>, vector<16x152xf32> -> vector<16x152xf32>
    %81 = vector.broadcast %75 : vector<16x1xf32> to vector<16x152xf32>
    %82 = arith.addf %80, %81 : vector<16x152xf32>
    %cst_44 = arith.constant 0.000000e+00 : f32
    %83 = vector.broadcast %cst_44 : f32 to vector<16x152xf32>
    %84 = arith.select %11, %82, %83 : vector<16x152xi1>, vector<16x152xf32>
    %85 = arith.addf %48, %84 : vector<16x152xf32>
    %cst_45 = arith.constant 0.000000e+00 : f32
    %86 = vector.broadcast %cst_45 : f32 to vector<16x152xf32>
    %87 = arith.cmpf ogt, %85, %86 : vector<16x152xf32>
    %cst_46 = arith.constant 1.000000e-01 : f32
    %88 = vector.broadcast %cst_46 : f32 to vector<16x152xf32>
    %89 = arith.mulf %88, %85 : vector<16x152xf32>
    %90 = arith.select %87, %85, %89 : vector<16x152xi1>, vector<16x152xf32>
    %c2 = arith.constant 2 : index
    %c0_47 = arith.constant 0 : index
    %c0_48 = arith.constant 0 : index
    %91 = vector.load %arg3[%c2, %c0_47, %c0_48] : memref<3x16x48xbf16, #tpu.memory_space<vmem>>, vector<1x16x48xbf16>
    %92 = vector.shape_cast %91 : vector<1x16x48xbf16> to vector<16x48xbf16>
    %c2_49 = arith.constant 2 : index
    %c0_50 = arith.constant 0 : index
    %c0_51 = arith.constant 0 : index
    %93 = vector.load %arg4[%c2_49, %c0_50, %c0_51] : memref<3x16x1xf32, #tpu.memory_space<vmem>>, vector<1x16x1xf32>
    %94 = vector.shape_cast %93 : vector<1x16x1xf32> to vector<16x1xf32>
    %c5_i32 = arith.constant 5 : i32
    %95 = tpu.dynamic_rotate %90 by %c5_i32 dim 1 : vector<16x152xf32>, i32 -> vector<16x152xf32>
    %c147_i32 = arith.constant 147 : i32
    %96 = tpu.dynamic_rotate %90 by %c147_i32 dim 1 : vector<16x152xf32>, i32 -> vector<16x152xf32>
    %97 = tpu.concatenate %95, %90, %96 in 0 : vector<16x152xf32>, vector<16x152xf32>, vector<16x152xf32> -> vector<48x152xf32>
    %98 = arith.truncf %97 : vector<48x152xf32> to vector<48x152xbf16>
    %cst_52 = arith.constant dense<0.000000e+00> : vector<16x152xf32>
    %99 = tpu.matmul %92, %98, %cst_52 {dimension_numbers = #tpu.dot_dimension_numbers<[1], [0], [0], [1], [0, 0, 1, 1], [], []>} : vector<16x48xbf16>, vector<48x152xbf16>, vector<16x152xf32> -> vector<16x152xf32>
    %100 = vector.broadcast %94 : vector<16x1xf32> to vector<16x152xf32>
    %101 = arith.addf %99, %100 : vector<16x152xf32>
    %cst_53 = arith.constant 0.000000e+00 : f32
    %102 = vector.broadcast %cst_53 : f32 to vector<16x152xf32>
    %103 = arith.select %11, %101, %102 : vector<16x152xi1>, vector<16x152xf32>
    %cst_54 = arith.constant 0.000000e+00 : f32
    %104 = vector.broadcast %cst_54 : f32 to vector<16x152xf32>
    %105 = arith.cmpf ogt, %103, %104 : vector<16x152xf32>
    %cst_55 = arith.constant 1.000000e-01 : f32
    %106 = vector.broadcast %cst_55 : f32 to vector<16x152xf32>
    %107 = arith.mulf %106, %103 : vector<16x152xf32>
    %108 = arith.select %105, %103, %107 : vector<16x152xi1>, vector<16x152xf32>
    %c2_56 = arith.constant 2 : index
    %c0_57 = arith.constant 0 : index
    %c0_58 = arith.constant 0 : index
    %109 = vector.load %arg5[%c2_56, %c0_57, %c0_58] : memref<3x16x48xbf16, #tpu.memory_space<vmem>>, vector<1x16x48xbf16>
    %110 = vector.shape_cast %109 : vector<1x16x48xbf16> to vector<16x48xbf16>
    %c2_59 = arith.constant 2 : index
    %c0_60 = arith.constant 0 : index
    %c0_61 = arith.constant 0 : index
    %111 = vector.load %arg6[%c2_59, %c0_60, %c0_61] : memref<3x16x1xf32, #tpu.memory_space<vmem>>, vector<1x16x1xf32>
    %112 = vector.shape_cast %111 : vector<1x16x1xf32> to vector<16x1xf32>
    %c1_i32_62 = arith.constant 1 : i32
    %113 = tpu.dynamic_rotate %108 by %c1_i32_62 dim 1 : vector<16x152xf32>, i32 -> vector<16x152xf32>
    %c151_i32_63 = arith.constant 151 : i32
    %114 = tpu.dynamic_rotate %108 by %c151_i32_63 dim 1 : vector<16x152xf32>, i32 -> vector<16x152xf32>
    %115 = tpu.concatenate %113, %108, %114 in 0 : vector<16x152xf32>, vector<16x152xf32>, vector<16x152xf32> -> vector<48x152xf32>
    %116 = arith.truncf %115 : vector<48x152xf32> to vector<48x152xbf16>
    %cst_64 = arith.constant dense<0.000000e+00> : vector<16x152xf32>
    %117 = tpu.matmul %110, %116, %cst_64 {dimension_numbers = #tpu.dot_dimension_numbers<[1], [0], [0], [1], [0, 0, 1, 1], [], []>} : vector<16x48xbf16>, vector<48x152xbf16>, vector<16x152xf32> -> vector<16x152xf32>
    %118 = vector.broadcast %112 : vector<16x1xf32> to vector<16x152xf32>
    %119 = arith.addf %117, %118 : vector<16x152xf32>
    %cst_65 = arith.constant 0.000000e+00 : f32
    %120 = vector.broadcast %cst_65 : f32 to vector<16x152xf32>
    %121 = arith.select %11, %119, %120 : vector<16x152xi1>, vector<16x152xf32>
    %122 = arith.addf %85, %121 : vector<16x152xf32>
    %123 = vector.extract_strided_slice %122 {offsets = [0, 12], sizes = [16, 128], strides = [1, 1]} : vector<16x152xf32> to vector<16x128xf32>
    %c0_66 = arith.constant 0 : index
    %c0_67 = arith.constant 0 : index
    %c0_68 = arith.constant 0 : index
    %124 = vector.load %arg7[%c0_66, %c0_67, %c0_68] : memref<1x16x128xf32, #tpu.memory_space<vmem>>, vector<1x16x128xf32>
    %125 = vector.shape_cast %124 : vector<1x16x128xf32> to vector<16x128xf32>
    %126 = vector.shape_cast %123 : vector<16x128xf32> to vector<1x16x128xf32>
    tpu.vector_store %arg7[%c0_66, %c0_67, %c0_68], %126 {strides = array<i32>} : memref<1x16x128xf32, #tpu.memory_space<vmem>>, vector<1x16x128xf32>,
    return
  }
  func.func @transform_0(%arg0: i32, %arg1: i32) -> (i32, i32, i32, i32) {
    %c0_i32 = arith.constant 0 : i32
    %c0_i32_0 = arith.constant 0 : i32
    %c0_i32_1 = arith.constant 0 : i32
    return %arg0, %arg1, %c0_i32, %c0_i32_0 : i32, i32, i32, i32
  }
  func.func @transform_1(%arg0: i32, %arg1: i32) -> (i32, i32, i32) {
    %c0_i32 = arith.constant 0 : i32
    %c0_i32_0 = arith.constant 0 : i32
    %c0_i32_1 = arith.constant 0 : i32
    %c0_i32_2 = arith.constant 0 : i32
    return %c0_i32, %c0_i32_0, %c0_i32_1 : i32, i32, i32
  }
  func.func @transform_2(%arg0: i32, %arg1: i32) -> (i32, i32, i32) {
    %c0_i32 = arith.constant 0 : i32
    %c0_i32_0 = arith.constant 0 : i32
    %c0_i32_1 = arith.constant 0 : i32
    %c0_i32_2 = arith.constant 0 : i32
    return %c0_i32, %c0_i32_0, %c0_i32_1 : i32, i32, i32
  }
  func.func @transform_3(%arg0: i32, %arg1: i32) -> (i32, i32, i32) {
    %c0_i32 = arith.constant 0 : i32
    %c0_i32_0 = arith.constant 0 : i32
    %c0_i32_1 = arith.constant 0 : i32
    %c0_i32_2 = arith.constant 0 : i32
    return %c0_i32, %c0_i32_0, %c0_i32_1 : i32, i32, i32
  }
  func.func @transform_4(%arg0: i32, %arg1: i32) -> (i32, i32, i32) {
    %c0_i32 = arith.constant 0 : i32
    %c0_i32_0 = arith.constant 0 : i32
    %c0_i32_1 = arith.constant 0 : i32
    %c0_i32_2 = arith.constant 0 : i32
    return %c0_i32, %c0_i32_0, %c0_i32_1 : i32, i32, i32
  }
  func.func @transform_5(%arg0: i32, %arg1: i32) -> (i32, i32, i32) {
    %c0_i32 = arith.constant 0 : i32
    %c0_i32_0 = arith.constant 0 : i32
    return %arg0, %c0_i32, %arg1 : i32, i32, i32
  }
}

</mosaic_0001>

<bundles_post_ra>
// kernel: tpu_custom_call.1
= control target key start
LH: loop header
LB: loop body
LE: loop exit
PB: predicated region body
PF: predicated region fallthrough
CT: control target
= control target key end

     0   :  { %10 = vsyncpa [#allocation3], 0  ;;  %s2198_s0 = inlined_call_operand.vmem [shape: f32[2,1,16,152], index: 0, kind: input, shape index: {}]   ;;  %s2199_s1 = inlined_call_operand.vmem [shape: bf16[3,16,48], index: 1, kind: input, shape index: {}]   ;;  %s2200_s2 = inlined_call_operand.vmem [shape: f32[3,16,1], index: 2, kind: input, shape index: {}]   ;;  %s2201_s3 = inlined_call_operand.vmem [shape: bf16[3,16,48], index: 3, kind: input, shape index: {}]   ;;  %s2202_s4 = inlined_call_operand.vmem [shape: f32[3,16,1], index: 4, kind: input, shape index: {}]   ;;  %s2203_s5 = inlined_call_operand.hbm [shape: f32[2,16,128], index: 5, kind: output, shape index: {}]  }
   0x1   :  { %12 = vsyncpa [#allocation3 + $0x1], 0  ;;  %s1805_s18 = smov 0   ;;  %s1807_s19 = smov 0  }
   0x2   :  { %s1809_s20 = smov 0   ;;  %s1811_s21 = smov 0  }
   0x3   :  { %s1813_s22 = smov 0   ;;  %s1815_s23 = smov 0  }
   0x4 LB: > { %s1376_s24 = sadd.s32 4294967295, %s1757_s23   ;;  %s1377_s25 = sadd.s32 4294967294, %s1757_s23   ;;  %s1757_s23 = sphi %s1815_s23, %s18_s23   ;;  %s1753_s22 = sphi %s1813_s22, %s2212_s22   ;;  %s1749_s21 = sphi %s1811_s21, %s2211_s21   ;;  %s1745_s20 = sphi %s1809_s20, %s2210_s20   ;;  %s1741_s19 = sphi %s1807_s19, %s2209_s19   ;;  %s1737_s18 = sphi %s1805_s18, %s2208_s18  }
   0x5   : > { %s30_s26 = sadd.s32 1, %s1753_s22  ;;  %s151_s27 = sadd.s32 1, %s1745_s20 }
   0x6   : > { %p32_p0 = scmp.ge.s32.totalorder %s30_s26, 2  ;;  %p161_p1 = scmp.ne.s32.totalorder %s1745_s20, %s1741_s19 }
   0x7   : > { %p162_p2 = scmp.eq.s32.totalorder %s1376_s24, 1  ;;  %p167_p3 = scmp.ne.s32.totalorder %s1741_s19, %s1737_s18 }
   0x8   : > { %s2214_s26 = smov (%p32_p0, %s30_s26), 0  ;;  %p168_p5 = scmp.eq.s32.totalorder %s1377_s25, 1 }
   0x9   : > { %p1845_p4 = por %p162_p2, %p161_p1  ;;  %s146_s29 = ssub.s32 %s1753_s22, %s2214_s26 }
   0xa   : > { %p1380_p6 = scmp.ge.s32.totalorder %s1757_s23, 1  ;;  %p149_p7 = scmp.eq.s32.totalorder %s146_s29, 0 }
   0xb   : > { %p1852_p8 = por %p168_p5, %p167_p3  ;;  %p210_p9 = scmp.lt.s32.totalorder %s1757_s23, 3 }
   0xc   : > { %s1858_s6 = scalar_select %p149_p7, %s1745_s20, %s151_s27  }
   0xd   : > { %p211_p10 = pnand %p1380_p6, %p210_p9 }
   0xe   : > { %p242_p11 = scmp.lt.s32.totalorder (!%p211_p10), %s1749_s21, 1  ;;  %s1759_s12 = smov (!%p211_p10), 24   ;;  %vm286_vm4 = vcmask (!%p211_p10), 1047744   ;;  %vm311_vm5 = vcmask (!%p211_p10), 187392   ;;  %v1763_v40 = vmov (!%p211_p10), 0   ;;  %vm328_vm6 = vcmask (!%p211_p10), 179200  }
   0xf   : > { %214 = sbr.rel (%p211_p10) target bundleno = 3700 (0xe74), region = 40  ;;  %s1760_s13 = smov (!%p211_p10), 23   ;;  %420 = vmatprep.mubr.bf16.mxu0 (!%p211_p10), %v1763_v40  ;;  %1519 = vset.pattern.permute.xlu0 (!%p211_p10), %v1763_v40  ;;  %v284_v49 = vld [vmem:[%s2200_s2] sm:$0xff] (!%p211_p10)  ;;  %v285_v52 = vld [vmem:[%s2200_s2 + $0x8] sm:$0xff] (!%p211_p10)  ;;  %vm374_vm7 = vcmask (!%p211_p10), 859136   ;;  %vm384_vm8 = vcmask (!%p211_p10), 392192   ;;  %v256_v63 = vlaneseq (!%p211_p10) }
  0x10   : > { %s1761_s14 = smov (!%p211_p10), 22   ;;  %s1762_s15 = smov (!%p211_p10), 105   ;;  %1520 = vset.pattern.permute.xlu1 (!%p211_p10), %v1763_v40  ;;  %580 = vmatprep.mubr.bf16.mxu1 (!%p211_p10), %v1763_v40  ;;  %v1671_v62 = vld [vmem:[%s2199_s1] sm:$0xff] (!%p211_p10)  }
  0x11   : > { %s1765_s24 = smov (!%p211_p10), 21   ;;  %s1766_s25 = smov (!%p211_p10), 18  }
  0x12   : > { %s1767_s27 = smov (!%p211_p10), 107   ;;  %s1769_s9 = smov (!%p211_p10), 14  }
  0x13   : > { %s1770_s10 = smov (!%p211_p10), 109  }
  0x16   : > { %s243_s7 = scalar_select %p242_p11, %s1749_s21, 1 }
  0x18   : > { %s1417_s8 = sshll.u32 %s243_s7, 5 }
  0x19   : > { %s1865_s11 = scalar_lea.vmem %s2198_s0, %s1417_s8  ;;  %s1768_s8 = smov 19  }
  0x1a   : > { %v1868_v0 = vld [vmem:[%s1865_s11] sm:$0xff]  ;;  %v1871_v1 = vld [vmem:[%s1865_s11 + $0x10] sm:$0xff]  ;;  %v255_v2 = vld [vmem:[%s1865_s11 + $0x18] sm:$0xff] }
  0x1b   : > { %vm270_vm0 = vcmp.gt.f32.partialorder %v1868_v0, 0.0  ;;  %vm272_vm1 = vcmp.gt.f32.partialorder %v1871_v1, 0.0  ;;  %v274_v3 = vmul.f32 0.1, %v1868_v0  ;;  %v276_v4 = vmul.f32 0.1, %v1871_v1 }
  0x1c   : > { %v253_v5 = vld [vmem:[%s1865_s11 + $0x8] sm:$0xff]  ;;  %vm273_vm2 = vcmp.gt.f32.partialorder %v255_v2, 0.0  ;;  %v277_v6 = vmul.f32 0.1, %v255_v2 }
  0x1d   : > { %v278_v7 = vsel %vm270_vm0, %v1868_v0, %v274_v3  ;;  %v280_v8 = vsel %vm272_vm1, %v1871_v1, %v276_v4  ;;  %vm271_vm3 = vcmp.gt.f32.partialorder %v253_v5, 0.0  ;;  %v275_v9 = vmul.f32 0.1, %v253_v5 }
  0x1e   : > { %v1489_v10 = vpack.i.bf16 %v280_v8, %v278_v7  ;;  %v1883_v12 = vsel %vm273_vm2, %v255_v2, %v277_v6  ;;  %v257_v2 = vand.u32 127, %v256_v63  ;;  %vm641_vm0 = vcmask 171008  }
  0x1f   : > { %v1881_v11 = vsel %vm271_vm3, %v253_v5, %v275_v9  ;;  %v1504_v14 = vpack.i.bf16 %v1883_v12, %v280_v8  ;;  %vm658_vm1 = vcmask 146432   ;;  %vm704_vm2 = vcmask 875520  }
  0x20   : > { %1490 = vrot.lane.b32.xlu0 %v1489_v10, %s1759_s12  ;;  %v1499_v13 = vpack.i.bf16 %v1881_v11, %v278_v7  ;;  %v262_v3 = vadd.s32 4294967284, %v257_v2 }
  0x22   : > { %1500 = vrot.lane.b32.xlu1 %v1499_v13, %s1760_s13  ;;  %vm264_vm9 = vcmp.ge.s32.totalorder %v262_v3, 0  ;;  %vm266_vm10 = vcmp.lt.s32.totalorder %v262_v3, 64 }
  0x23   : > { %vm1927_vm11 = vmand %vm264_vm9, %vm266_vm10 }
  0x26   : > { %1505 = vrot.lane.b32.xlu1 %v1504_v14, %s1760_s13 }
  0x92   : > { %v1491_v15 = vpop.permute.xlu0 %1490 }
  0x93   : > { %v1493_v16 = vunpack.i.h.bf16 %v1491_v15  ;;  %v1492_v17 = vunpack.i.l.bf16 %v1491_v15 }
  0x94   : > { %v1501_v18 = vpop.permute.xlu1 %1500 }
  0x95   : > { %v292_v19 = vsel %vm286_vm4, %v1493_v16, %v1883_v12  ;;  %v289_v20 = vsel %vm286_vm4, %v1492_v17, %v1881_v11  ;;  %v1503_v21 = vunpack.i.h.bf16 %v1501_v18  ;;  %v1502_v22 = vunpack.i.l.bf16 %v1501_v18 }
  0x96   : > { %v1514_v23 = vpack.i.bf16 %v292_v19, %v280_v8  ;;  %v1494_v24 = vpack.i.bf16 %v292_v19, %v289_v20  ;;  %v1509_v29 = vpack.i.bf16 %v289_v20, %v278_v7  ;;  %v335_v32 = vpack.c.bf16 %v292_v19, %v289_v20 }
  0x97   : > { %v312_v25 = vsel %vm311_vm5, %v1502_v22, %v1503_v21 }
  0x98   : > { %1515 = vrot.lane.b32.xlu1 %v1514_v23, %s1761_s14  ;;  %1495 = vrot.lane.b32.xlu0 %v1494_v24, %s1759_s12  ;;  %v1506_v26 = vpop.permute.xlu1 %1505 }
  0x99   : > { %v1508_v27 = vunpack.i.h.bf16 %v1506_v26  ;;  %v1507_v28 = vunpack.i.l.bf16 %v1506_v26 }
  0x9b   : > { %v313_v30 = vsel %vm311_vm5, %v1507_v28, %v1508_v27  ;;  %v337_v33 = vpack.c.bf16 %v1507_v28, %v1502_v22  ;;  %v1764_v22 = vmov 0.0  }
  0x9c   : > { %1510 = vrot.lane.b32.xlu0 %v1509_v29, %s1761_s14  ;;  %v338_v31 = vpack.c.bf16 %v313_v30, %v312_v25 }
  0xa0   : > { %362 = vrot.lane.b32.xlu0 %v335_v32, %s1762_s15 }
  0xa4   : > { %366 = vrot.lane.b32.xlu0 %v337_v33, %s1762_s15 }
 0x10a   : > { %v1496_v34 = vpop.permute.xlu0 %1495  ;;  %v1516_v37 = vpop.permute.xlu1 %1515 }
 0x10b   : > { %v1498_v35 = vunpack.i.h.bf16 %v1496_v34  ;;  %v1497_v36 = vunpack.i.l.bf16 %v1496_v34  ;;  %v1517_v43 = vunpack.i.l.bf16 %v1516_v37  ;;  %v1518_v46 = vunpack.i.h.bf16 %v1516_v37 }
 0x10d   : > { %v297_v38 = vsel %vm286_vm4, %v1497_v36, %v1492_v17  ;;  %v298_v39 = vsel %vm286_vm4, %v1498_v35, %v1493_v16  ;;  %v330_v50 = vsel %vm328_vm6, %v1517_v43, %v1518_v46 }
 0x10e   : > { %v1511_v41 = vpop.permute.xlu0 %1510  ;;  %v336_v42 = vpack.c.bf16 %v298_v39, %v297_v38 }
 0x10f   : > { %v1513_v44 = vunpack.i.h.bf16 %v1511_v41  ;;  %v1512_v45 = vunpack.i.l.bf16 %v1511_v41 }
 0x110   : > { %364 = vrot.lane.b32.xlu1 %v336_v42, %s1762_s15 }
 0x111   : > { %v339_v47 = vpack.c.bf16 %v1517_v43, %v1512_v45  ;;  %v329_v48 = vsel %vm328_vm6, %v1512_v45, %v1513_v44 }
 0x112   : > { %v340_v51 = vpack.c.bf16 %v330_v50, %v329_v48  ;;  %v363_v53 = vpop.permute.xlu0 %362 }
 0x113   : > { %370 = vrot.lane.b32.xlu0 %v339_v47, %s1762_s15 }
 0x114   : > { %368 = vrot.lane.b32.xlu1 %v338_v31, %s1762_s15 }
 0x116   : > { %v367_v56 = vpop.permute.xlu0 %366 }
 0x117   : > { %343 = vperm.xlu0 %1519, %v284_v49  }
 0x118   : > { %372 = vrot.lane.b32.xlu1 %v340_v51, %s1762_s15 }
 0x11c   : > { %348 = vperm.xlu1 %1520, %v285_v52  }
 0x182   : > { %v365_v54 = vpop.permute.xlu1 %364 }
 0x183   : > { %388 = vmatprep.subr.bf16.mxu0 %v365_v54  ;;  %v375_v55 = vsel %vm374_vm7, %v363_v53, %v365_v54 }
 0x184   : > { %389 = vmatpush1.bf16.msra.mxu0 %v375_v55 }
 0x185   : > { %v371_v59 = vpop.permute.xlu0 %370 }
 0x186   : > { %v369_v57 = vpop.permute.xlu1 %368 }
 0x187   : > { %390 = vmatprep.subr.bf16.mxu0 %v369_v57  ;;  %v376_v58 = vsel %vm374_vm7, %v367_v56, %v369_v57 }
 0x188   : > { %391 = vmatpush1.bf16.msra.mxu0 %v376_v58 }
 0x18a   : > { %v373_v60 = vpop.permute.xlu1 %372 }
 0x18b   : > { %392 = vmatprep.subr.bf16.mxu0 %v373_v60  ;;  %v377_v61 = vsel %vm374_vm7, %v371_v59, %v373_v60 }
 0x18c   : > { %393 = vmatpush1.bf16.msra.mxu0 %v377_v61  ;;  %v449_v61 = vld [vmem:[%s2202_s4] sm:$0xff] }
 0x18f   : > { %1385 = vmatmul.mubr.msk.bf16.vlgmr.msra.gmra.mrb[0].mxu0 %vm384_vm8, %v1671_v62  ;;  %v450_v62 = vld [vmem:[%s2202_s4 + $0x8] sm:$0xff] }
 0x190   : > { %749 = vmatprep.mubr.bf16.mxu0 %v1763_v40 }
 0x196   : > { %v344_v4 = vpop.permute.xlu0 %343 }
 0x19b   : > { %v349_v7 = vpop.permute.xlu1 %348 }
 0x262   : > { %v422_v5 = vpop.f32.mrb[0].mxu0 }
 0x263   : > { %v423_v8 = vadd.f32 %v422_v5, %v344_v4  ;;  %v424_v9 = vpop.f32.mrb[1].mxu0 }
 0x264   : > { %v426_v10 = vpop.f32.mrb[2].mxu0 }
 0x265   : > { %v431_v13 = vsel %vm1927_vm11, %v423_v8, 0.0  ;;  %v427_v14 = vadd.f32 %v426_v10, %v349_v7  ;;  %v428_v15 = vpop.f32.mrb[3].mxu0 }
 0x266   : > { %v439_v16 = vmul.f32 0.1, %v431_v13  ;;  %vm435_vm12 = vcmp.gt.f32.partialorder %v431_v13, 0.0 }
 0x267   : > { %v433_v17 = vsel %vm1927_vm11, %v427_v14, 0.0 }
 0x268   : > { %vm437_vm13 = vcmp.gt.f32.partialorder %v433_v17, 0.0  ;;  %v441_v18 = vmul.f32 0.1, %v433_v17  ;;  %v443_v19 = vsel %vm435_vm12, %v431_v13, %v439_v16  ;;  %v1672_v13 = vld [vmem:[%s2201_s3] sm:$0xff]  }
 0x269   : > { %v1526_v23 = vpack.i.bf16 %v1764_v22, %v443_v19 }
 0x26a   : > { %v445_v20 = vsel %vm437_vm13, %v433_v17, %v441_v18  ;;  %vm972_vm13 = vcmask 154624  }
 0x26b   : > { %v1521_v21 = vpack.i.bf16 %v445_v20, %v443_v19  ;;  %v1536_v31 = vpack.i.bf16 %v1764_v22, %v445_v20 }
 0x26d   : > { %1522 = vrot.lane.b32.xlu1 %v1521_v21, %s1759_s12 }
 0x271   : > { %1527 = vrot.lane.b32.xlu1 %v1526_v23, %s1760_s13 }
 0x2df   : > { %v1523_v24 = vpop.permute.xlu1 %1522 }
 0x2e0   : > { %v1525_v25 = vunpack.i.h.bf16 %v1523_v24  ;;  %v1524_v26 = vunpack.i.l.bf16 %v1523_v24 }
 0x2e2   : > { %v456_v27 = vsel %vm286_vm4, %v1525_v25, 0.0  ;;  %v453_v28 = vsel %vm286_vm4, %v1524_v26, 0.0 }
 0x2e3   : > { %v1541_v29 = vpack.i.bf16 %v453_v28, %v443_v19  ;;  %v1531_v30 = vpack.i.bf16 %v456_v27, %v453_v28  ;;  %v497_v32 = vpack.c.bf16 %v456_v27, %v453_v28  ;;  %v1546_v33 = vpack.i.bf16 %v456_v27, %v445_v20  ;;  %v1528_v34 = vpop.permute.xlu1 %1527 }
 0x2e4   : > { %v1530_v38 = vunpack.i.h.bf16 %v1528_v34  ;;  %v1529_v39 = vunpack.i.l.bf16 %v1528_v34 }
 0x2e5   : > { %1542 = vrot.lane.b32.xlu1 %v1541_v29, %s1761_s14  ;;  %1532 = vrot.lane.b32.xlu0 %v1531_v30, %s1759_s12 }
 0x2e6   : > { %v475_v48 = vsel %vm311_vm5, %v1529_v39, %v1530_v38 }
 0x2e9   : > { %1537 = vrot.lane.b32.xlu0 %v1536_v31, %s1760_s13  ;;  %524 = vrot.lane.b32.xlu1 %v497_v32, %s1762_s15 }
 0x2ed   : > { %1547 = vrot.lane.b32.xlu0 %v1546_v33, %s1761_s14 }
 0x357   : > { %v1533_v35 = vpop.permute.xlu0 %1532  ;;  %v1543_v43 = vpop.permute.xlu1 %1542 }
 0x358   : > { %v1535_v36 = vunpack.i.h.bf16 %v1533_v35  ;;  %v1534_v37 = vunpack.i.l.bf16 %v1533_v35  ;;  %v1545_v49 = vunpack.i.h.bf16 %v1543_v43  ;;  %v1544_v50 = vunpack.i.l.bf16 %v1543_v43 }
 0x35a   : > { %v461_v41 = vsel %vm286_vm4, %v1534_v37, %v1524_v26  ;;  %v462_v42 = vsel %vm286_vm4, %v1535_v36, %v1525_v25  ;;  %v491_v58 = vsel %vm328_vm6, %v1544_v50, %v1545_v49 }
 0x35b   : > { %v1538_v44 = vpop.permute.xlu0 %1537  ;;  %v498_v45 = vpack.c.bf16 %v462_v42, %v461_v41  ;;  %v525_v63 = vpop.permute.xlu1 %524 }
 0x35c   : > { %v1540_v46 = vunpack.i.h.bf16 %v1538_v44  ;;  %v1539_v47 = vunpack.i.l.bf16 %v1538_v44 }
 0x35d   : > { %526 = vrot.lane.b32.xlu0 %v498_v45, %s1762_s15 }
 0x35e   : > { %v499_v51 = vpack.c.bf16 %v1539_v47, %v1529_v39  ;;  %v476_v52 = vsel %vm311_vm5, %v1539_v47, %v1540_v46 }
 0x35f   : > { %v1548_v53 = vpop.permute.xlu0 %1547  ;;  %v500_v54 = vpack.c.bf16 %v476_v52, %v475_v48 }
 0x360   : > { %v1550_v55 = vunpack.i.h.bf16 %v1548_v53  ;;  %v1549_v56 = vunpack.i.l.bf16 %v1548_v53  ;;  %528 = vrot.lane.b32.xlu1 %v499_v51, %s1762_s15 }
 0x361   : > { %530 = vrot.lane.b32.xlu0 %v500_v54, %s1762_s15 }
 0x362   : > { %v501_v57 = vpack.c.bf16 %v1549_v56, %v1544_v50  ;;  %v492_v59 = vsel %vm328_vm6, %v1549_v56, %v1550_v55 }
 0x363   : > { %v502_v60 = vpack.c.bf16 %v492_v59, %v491_v58 }
 0x364   : > { %532 = vrot.lane.b32.xlu1 %v501_v57, %s1762_s15 }
 0x365   : > { %534 = vrot.lane.b32.xlu0 %v502_v60, %s1762_s15 }
 0x368   : > { %505 = vperm.xlu1 %1520, %v449_v61  }
 0x369   : > { %510 = vperm.xlu0 %1519, %v450_v62  }
 0x3cf   : > { %v527_v2 = vpop.permute.xlu0 %526 }
 0x3d0   : > { %548 = vmatprep.subr.bf16.mxu1 %v527_v2  ;;  %v536_v3 = vsel %vm374_vm7, %v525_v63, %v527_v2 }
 0x3d1   : > { %549 = vmatpush1.bf16.msra.mxu1 %v536_v3 }
 0x3d2   : > { %v529_v4 = vpop.permute.xlu1 %528 }
 0x3d3   : > { %v531_v5 = vpop.permute.xlu0 %530 }
 0x3d4   : > { %550 = vmatprep.subr.bf16.mxu1 %v531_v5  ;;  %v537_v7 = vsel %vm374_vm7, %v529_v4, %v531_v5 }
 0x3d5   : > { %551 = vmatpush1.bf16.msra.mxu1 %v537_v7  ;;  %v1390_v7 = vld [vmem:[%s2200_s2 + $0x10] sm:$0xff] }
 0x3d6   : > { %v533_v8 = vpop.permute.xlu1 %532 }
 0x3d7   : > { %v535_v9 = vpop.permute.xlu0 %534 }
 0x3d8   : > { %552 = vmatprep.subr.bf16.mxu1 %v535_v9  ;;  %v538_v10 = vsel %vm374_vm7, %v533_v8, %v535_v9  ;;  %v1391_v8 = vld [vmem:[%s2200_s2 + $0x18] sm:$0xff] }
 0x3d9   : > { %553 = vmatpush1.bf16.msra.mxu1 %v538_v10 }
 0x3dc   : > { %1387 = vmatmul.mubr.msk.bf16.vlgmr.msra.gmra.mrb[0].mxu1 %vm384_vm8, %v1672_v13 }
 0x3dd   : > { %911 = vmatprep.mubr.bf16.mxu1 %v1763_v40 }
 0x3e7   : > { %v506_v14 = vpop.permute.xlu1 %505 }
 0x3e8   : > { %v511_v18 = vpop.permute.xlu0 %510 }
 0x4af   : > { %v582_v15 = vpop.f32.mrb[0].mxu1 }
 0x4b0   : > { %v583_v16 = vadd.f32 %v582_v15, %v506_v14  ;;  %v584_v17 = vpop.f32.mrb[1].mxu1 }
 0x4b1   : > { %v586_v19 = vpop.f32.mrb[2].mxu1 }
 0x4b2   : > { %v591_v20 = vsel %vm1927_vm11, %v583_v16, 0.0  ;;  %v587_v21 = vadd.f32 %v586_v19, %v511_v18  ;;  %v588_v23 = vpop.f32.mrb[3].mxu1 }
 0x4b3   : > { %v1974_v24 = vadd.f32 %v591_v20, %v1868_v0  ;;  %v1673_v20 = vld [vmem:[%s2199_s1 + $0x8] sm:$0xff]  }
 0x4b4   : > { %v593_v25 = vsel %vm1927_vm11, %v587_v21, 0.0 }
 0x4b5   : > { %v1979_v26 = vadd.f32 %v593_v25, %v1871_v1  ;;  %v603_v27 = vmul.f32 0.1, %v1974_v24  ;;  %vm599_vm14 = vcmp.gt.f32.partialorder %v1974_v24, 0.0 }
 0x4b7   : > { %vm601_vm15 = vcmp.gt.f32.partialorder %v1979_v26, 0.0  ;;  %v605_v28 = vmul.f32 0.1, %v1979_v26  ;;  %v607_v29 = vsel %vm599_vm14, %v1974_v24, %v603_v27  ;;  %vm989_vm14 = vcmask 113664  }
 0x4b8   : > { %v1556_v31 = vpack.i.bf16 %v1881_v11, %v607_v29 }
 0x4b9   : > { %v609_v30 = vsel %vm601_vm15, %v1979_v26, %v605_v28  ;;  %vm1035_vm15 = vcmask 891904  }
 0x4ba   : > { %v1551_v0 = vpack.i.bf16 %v609_v30, %v607_v29  ;;  %v1566_v38 = vpack.i.bf16 %v1883_v12, %v609_v30 }
 0x4bc   : > { %1552 = vrot.lane.b32.xlu1 %v1551_v0, %s1759_s12 }
 0x4c0   : > { %1557 = vrot.lane.b32.xlu1 %v1556_v31, %s1765_s24 }
 0x52e   : > { %v1553_v1 = vpop.permute.xlu1 %1552 }
 0x52f   : > { %v1555_v32 = vunpack.i.h.bf16 %v1553_v1  ;;  %v1554_v33 = vunpack.i.l.bf16 %v1553_v1 }
 0x531   : > { %v619_v34 = vsel %vm286_vm4, %v1554_v33, %v1881_v11  ;;  %v622_v35 = vsel %vm286_vm4, %v1555_v32, %v1883_v12 }
 0x532   : > { %v1571_v36 = vpack.i.bf16 %v619_v34, %v607_v29  ;;  %v1561_v37 = vpack.i.bf16 %v622_v35, %v619_v34  ;;  %v665_v39 = vpack.c.bf16 %v622_v35, %v619_v34  ;;  %v1576_v41 = vpack.i.bf16 %v622_v35, %v609_v30  ;;  %v1558_v42 = vpop.permute.xlu1 %1557 }
 0x533   : > { %v1560_v46 = vunpack.i.h.bf16 %v1558_v42  ;;  %v1559_v47 = vunpack.i.l.bf16 %v1558_v42 }
 0x534   : > { %1572 = vrot.lane.b32.xlu1 %v1571_v36, %s1766_s25  ;;  %1562 = vrot.lane.b32.xlu0 %v1561_v37, %s1759_s12 }
 0x535   : > { %v642_v55 = vsel %vm641_vm0, %v1559_v47, %v1560_v46 }
 0x538   : > { %1567 = vrot.lane.b32.xlu0 %v1566_v38, %s1765_s24  ;;  %692 = vrot.lane.b32.xlu1 %v665_v39, %s1767_s27  ;;  %s1418_s24 = sshll.u32 %s1749_s21, 8  ;;  %s1772_s21 = smov [#allocation2]  }
 0x539   : > { %s2150_s29 = scalar_lea.hbm %s2203_s5, %s1418_s24 }
 0x53c   : > { %1577 = vrot.lane.b32.xlu0 %v1576_v41, %s1766_s25 }
 0x5a6   : > { %v1563_v43 = vpop.permute.xlu0 %1562  ;;  %v1573_v50 = vpop.permute.xlu1 %1572 }
 0x5a7   : > { %v1565_v44 = vunpack.i.h.bf16 %v1563_v43  ;;  %v1564_v45 = vunpack.i.l.bf16 %v1563_v43  ;;  %v1575_v56 = vunpack.i.h.bf16 %v1573_v50  ;;  %v1574_v57 = vunpack.i.l.bf16 %v1573_v50 }
 0x5a9   : > { %v627_v48 = vsel %vm286_vm4, %v1564_v45, %v1554_v33  ;;  %v628_v49 = vsel %vm286_vm4, %v1565_v44, %v1555_v32  ;;  %v659_v3 = vsel %vm658_vm1, %v1574_v57, %v1575_v56 }
 0x5aa   : > { %v1568_v51 = vpop.permute.xlu0 %1567  ;;  %v666_v52 = vpack.c.bf16 %v628_v49, %v627_v48  ;;  %v693_v9 = vpop.permute.xlu1 %692 }
 0x5ab   : > { %v1570_v53 = vunpack.i.h.bf16 %v1568_v51  ;;  %v1569_v54 = vunpack.i.l.bf16 %v1568_v51 }
 0x5ac   : > { %694 = vrot.lane.b32.xlu0 %v666_v52, %s1767_s27 }
 0x5ad   : > { %v667_v58 = vpack.c.bf16 %v1569_v54, %v1559_v47  ;;  %v643_v59 = vsel %vm641_vm0, %v1569_v54, %v1570_v53 }
 0x5ae   : > { %v1578_v60 = vpop.permute.xlu0 %1577  ;;  %v668_v61 = vpack.c.bf16 %v643_v59, %v642_v55 }
 0x5af   : > { %v1580_v62 = vunpack.i.h.bf16 %v1578_v60  ;;  %v1579_v63 = vunpack.i.l.bf16 %v1578_v60  ;;  %696 = vrot.lane.b32.xlu1 %v667_v58, %s1767_s27 }
 0x5b0   : > { %698 = vrot.lane.b32.xlu0 %v668_v61, %s1767_s27 }
 0x5b1   : > { %v669_v2 = vpack.c.bf16 %v1579_v63, %v1574_v57  ;;  %v660_v4 = vsel %vm658_vm1, %v1579_v63, %v1580_v62 }
 0x5b2   : > { %v670_v5 = vpack.c.bf16 %v660_v4, %v659_v3 }
 0x5b3   : > { %700 = vrot.lane.b32.xlu1 %v669_v2, %s1767_s27 }
 0x5b4   : > { %702 = vrot.lane.b32.xlu0 %v670_v5, %s1767_s27 }
 0x5b7   : > { %673 = vperm.xlu1 %1520, %v1390_v7  }
 0x5b8   : > { %678 = vperm.xlu0 %1519, %v1391_v8  }
 0x61e   : > { %v695_v10 = vpop.permute.xlu0 %694 }
 0x61f   : > { %v705_v13 = vsel %vm704_vm2, %v693_v9, %v695_v10  ;;  %717 = vmatprep.subr.bf16.mxu0 %v695_v10 }
 0x620   : > { %718 = vmatpush1.bf16.msra.mxu0 %v705_v13 }
 0x621   : > { %v697_v14 = vpop.permute.xlu1 %696 }
 0x622   : > { %v699_v15 = vpop.permute.xlu0 %698 }
 0x623   : > { %v706_v16 = vsel %vm704_vm2, %v697_v14, %v699_v15  ;;  %719 = vmatprep.subr.bf16.mxu0 %v699_v15 }
 0x624   : > { %720 = vmatpush1.bf16.msra.mxu0 %v706_v16  ;;  %v1396_v16 = vld [vmem:[%s2202_s4 + $0x10] sm:$0xff] }
 0x625   : > { %v701_v17 = vpop.permute.xlu1 %700 }
 0x626   : > { %v703_v18 = vpop.permute.xlu0 %702 }
 0x627   : > { %v707_v19 = vsel %vm704_vm2, %v701_v17, %v703_v18  ;;  %721 = vmatprep.subr.bf16.mxu0 %v703_v18  ;;  %v1397_v17 = vld [vmem:[%s2202_s4 + $0x18] sm:$0xff] }
 0x628   : > { %722 = vmatpush1.bf16.msra.mxu0 %v707_v19 }
 0x62b   : > { %1393 = vmatmul.mubr.msk.bf16.vlgmr.msra.gmra.mrb[4].mxu0 %vm384_vm8, %v1673_v20 }
 0x62c   : > { %1080 = vmatprep.mubr.bf16.mxu0 %v1763_v40 }
 0x636   : > { %v674_v21 = vpop.permute.xlu1 %673 }
 0x637   : > { %v679_v28 = vpop.permute.xlu0 %678 }
 0x6fe   : > { %v751_v23 = vpop.f32.mrb[4].mxu0 }
 0x6ff   : > { %v752_v25 = vadd.f32 %v751_v23, %v674_v21  ;;  %v753_v27 = vpop.f32.mrb[5].mxu0 }
 0x700   : > { %v755_v29 = vpop.f32.mrb[6].mxu0 }
 0x701   : > { %v760_v30 = vsel %vm1927_vm11, %v752_v25, 0.0  ;;  %v756_v0 = vadd.f32 %v755_v29, %v679_v28  ;;  %v757_v31 = vpop.f32.mrb[7].mxu0 }
 0x702   : > { %v768_v1 = vmul.f32 0.1, %v760_v30  ;;  %vm764_vm3 = vcmp.gt.f32.partialorder %v760_v30, 0.0 }
 0x703   : > { %v762_v32 = vsel %vm1927_vm11, %v756_v0, 0.0 }
 0x704   : > { %vm766_vm9 = vcmp.gt.f32.partialorder %v762_v32, 0.0  ;;  %v770_v33 = vmul.f32 0.1, %v762_v32  ;;  %v772_v34 = vsel %vm764_vm3, %v760_v30, %v768_v1  ;;  %v1674_v30 = vld [vmem:[%s2201_s3 + $0x8] sm:$0xff]  }
 0x705   : > { %v1586_v37 = vpack.i.bf16 %v1764_v22, %v772_v34 }
 0x706   : > { %v774_v35 = vsel %vm766_vm9, %v762_v32, %v770_v33 }
 0x707   : > { %v1581_v36 = vpack.i.bf16 %v774_v35, %v772_v34  ;;  %v1596_v46 = vpack.i.bf16 %v1764_v22, %v774_v35 }
 0x709   : > { %1582 = vrot.lane.b32.xlu1 %v1581_v36, %s1759_s12 }
 0x70d   : > { %1587 = vrot.lane.b32.xlu1 %v1586_v37, %s1760_s13 }
 0x77b   : > { %v1583_v38 = vpop.permute.xlu1 %1582 }
 0x77c   : > { %v1585_v39 = vunpack.i.h.bf16 %v1583_v38  ;;  %v1584_v41 = vunpack.i.l.bf16 %v1583_v38 }
 0x77e   : > { %v787_v42 = vsel %vm286_vm4, %v1585_v39, 0.0  ;;  %v784_v43 = vsel %vm286_vm4, %v1584_v41, 0.0 }
 0x77f   : > { %v1601_v44 = vpack.i.bf16 %v784_v43, %v772_v34  ;;  %v1591_v45 = vpack.i.bf16 %v787_v42, %v784_v43  ;;  %v828_v47 = vpack.c.bf16 %v787_v42, %v784_v43  ;;  %v1606_v48 = vpack.i.bf16 %v787_v42, %v774_v35  ;;  %v1588_v49 = vpop.permute.xlu1 %1587 }
 0x780   : > { %v1590_v53 = vunpack.i.h.bf16 %v1588_v49  ;;  %v1589_v54 = vunpack.i.l.bf16 %v1588_v49 }
 0x781   : > { %1602 = vrot.lane.b32.xlu1 %v1601_v44, %s1761_s14  ;;  %1592 = vrot.lane.b32.xlu0 %v1591_v45, %s1759_s12 }
 0x782   : > { %v806_v62 = vsel %vm311_vm5, %v1589_v54, %v1590_v53 }
 0x785   : > { %1597 = vrot.lane.b32.xlu0 %v1596_v46, %s1760_s13  ;;  %855 = vrot.lane.b32.xlu1 %v828_v47, %s1762_s15 }
 0x789   : > { %1607 = vrot.lane.b32.xlu0 %v1606_v48, %s1761_s14 }
 0x7f3   : > { %v1593_v50 = vpop.permute.xlu0 %1592  ;;  %v1603_v57 = vpop.permute.xlu1 %1602 }
 0x7f4   : > { %v1595_v51 = vunpack.i.h.bf16 %v1593_v50  ;;  %v1594_v52 = vunpack.i.l.bf16 %v1593_v50  ;;  %v1605_v63 = vunpack.i.h.bf16 %v1603_v57  ;;  %v1604_v2 = vunpack.i.l.bf16 %v1603_v57 }
 0x7f6   : > { %v792_v55 = vsel %vm286_vm4, %v1594_v52, %v1584_v41  ;;  %v793_v56 = vsel %vm286_vm4, %v1595_v51, %v1585_v39  ;;  %v822_v13 = vsel %vm328_vm6, %v1604_v2, %v1605_v63 }
 0x7f7   : > { %v1598_v58 = vpop.permute.xlu0 %1597  ;;  %v829_v59 = vpack.c.bf16 %v793_v56, %v792_v55  ;;  %v856_v18 = vpop.permute.xlu1 %855 }
 0x7f8   : > { %v1600_v60 = vunpack.i.h.bf16 %v1598_v58  ;;  %v1599_v61 = vunpack.i.l.bf16 %v1598_v58 }
 0x7f9   : > { %857 = vrot.lane.b32.xlu0 %v829_v59, %s1762_s15 }
 0x7fa   : > { %v830_v3 = vpack.c.bf16 %v1599_v61, %v1589_v54  ;;  %v807_v4 = vsel %vm311_vm5, %v1599_v61, %v1600_v60 }
 0x7fb   : > { %v1608_v5 = vpop.permute.xlu0 %1607  ;;  %v831_v7 = vpack.c.bf16 %v807_v4, %v806_v62 }
 0x7fc   : > { %v1610_v8 = vunpack.i.h.bf16 %v1608_v5  ;;  %v1609_v9 = vunpack.i.l.bf16 %v1608_v5  ;;  %859 = vrot.lane.b32.xlu1 %v830_v3, %s1762_s15 }
 0x7fd   : > { %861 = vrot.lane.b32.xlu0 %v831_v7, %s1762_s15 }
 0x7fe   : > { %v832_v10 = vpack.c.bf16 %v1609_v9, %v1604_v2  ;;  %v823_v14 = vsel %vm328_vm6, %v1609_v9, %v1610_v8 }
 0x7ff   : > { %v833_v15 = vpack.c.bf16 %v823_v14, %v822_v13 }
 0x800   : > { %863 = vrot.lane.b32.xlu1 %v832_v10, %s1762_s15 }
 0x801   : > { %865 = vrot.lane.b32.xlu0 %v833_v15, %s1762_s15 }
 0x804   : > { %836 = vperm.xlu1 %1520, %v1396_v16  }
 0x805   : > { %841 = vperm.xlu0 %1519, %v1397_v17  }
 0x86b   : > { %v858_v19 = vpop.permute.xlu0 %857 }
 0x86c   : > { %v867_v20 = vsel %vm374_vm7, %v856_v18, %v858_v19  ;;  %879 = vmatprep.subr.bf16.mxu1 %v858_v19 }
 0x86d   : > { %880 = vmatpush1.bf16.msra.mxu1 %v867_v20  ;;  %v1402_v20 = vld [vmem:[%s2200_s2 + $0x20] sm:$0xff] }
 0x86e   : > { %v860_v21 = vpop.permute.xlu1 %859 }
 0x86f   : > { %v862_v23 = vpop.permute.xlu0 %861 }
 0x870   : > { %v868_v25 = vsel %vm374_vm7, %v860_v21, %v862_v23  ;;  %881 = vmatprep.subr.bf16.mxu1 %v862_v23  ;;  %v1403_v21 = vld [vmem:[%s2200_s2 + $0x28] sm:$0xff] }
 0x871   : > { %882 = vmatpush1.bf16.msra.mxu1 %v868_v25 }
 0x872   : > { %v864_v27 = vpop.permute.xlu1 %863 }
 0x873   : > { %v866_v28 = vpop.permute.xlu0 %865 }
 0x874   : > { %v869_v29 = vsel %vm374_vm7, %v864_v27, %v866_v28  ;;  %883 = vmatprep.subr.bf16.mxu1 %v866_v28 }
 0x875   : > { %884 = vmatpush1.bf16.msra.mxu1 %v869_v29 }
 0x878   : > { %1399 = vmatmul.mubr.msk.bf16.vlgmr.msra.gmra.mrb[4].mxu1 %vm384_vm8, %v1674_v30 }
 0x879   : > { %1242 = vmatprep.mubr.bf16.mxu1 %v1763_v40 }
 0x883   : > { %v837_v0 = vpop.permute.xlu1 %836 }
 0x884   : > { %v842_v33 = vpop.permute.xlu0 %841 }
 0x94b   : > { %v913_v31 = vpop.f32.mrb[4].mxu1 }
 0x94c   : > { %v914_v1 = vadd.f32 %v913_v31, %v837_v0  ;;  %v915_v32 = vpop.f32.mrb[5].mxu1 }
 0x94d   : > { %v917_v34 = vpop.f32.mrb[6].mxu1  ;;  %v1675_v32 = vld [vmem:[%s2199_s1 + $0x10] sm:$0xff]  }
 0x94e   : > { %v922_v35 = vsel %vm1927_vm11, %v914_v1, 0.0  ;;  %v918_v36 = vadd.f32 %v917_v34, %v842_v33  ;;  %v919_v37 = vpop.f32.mrb[7].mxu1 }
 0x94f   : > { %v2057_v38 = vadd.f32 %v922_v35, %v1974_v24 }
 0x950   : > { %v924_v39 = vsel %vm1927_vm11, %v918_v36, 0.0 }
 0x951   : > { %v2062_v41 = vadd.f32 %v924_v39, %v1979_v26  ;;  %v934_v40 = vmul.f32 0.1, %v2057_v38  ;;  %vm930_vm10 = vcmp.gt.f32.partialorder %v2057_v38, 0.0 }
 0x953   : > { %vm932_vm12 = vcmp.gt.f32.partialorder %v2062_v41, 0.0  ;;  %v936_v42 = vmul.f32 0.1, %v2062_v41  ;;  %v938_v43 = vsel %vm930_vm10, %v2057_v38, %v934_v40 }
 0x954   : > { %v1616_v45 = vpack.i.bf16 %v1881_v11, %v938_v43 }
 0x955   : > { %v940_v44 = vsel %vm932_vm12, %v2062_v41, %v936_v42 }
 0x956   : > { %v1611_v24 = vpack.i.bf16 %v940_v44, %v938_v43  ;;  %v1626_v52 = vpack.i.bf16 %v1883_v12, %v940_v44 }
 0x958   : > { %1612 = vrot.lane.b32.xlu1 %v1611_v24, %s1759_s12 }
 0x95c   : > { %1617 = vrot.lane.b32.xlu1 %v1616_v45, %s1768_s8 }
 0x9ca   : > { %v1613_v26 = vpop.permute.xlu1 %1612 }
 0x9cb   : > { %v1615_v46 = vunpack.i.h.bf16 %v1613_v26  ;;  %v1614_v47 = vunpack.i.l.bf16 %v1613_v26 }
 0x9cd   : > { %v950_v48 = vsel %vm286_vm4, %v1614_v47, %v1881_v11  ;;  %v953_v49 = vsel %vm286_vm4, %v1615_v46, %v1883_v12 }
 0x9ce   : > { %v1631_v50 = vpack.i.bf16 %v950_v48, %v938_v43  ;;  %v1621_v51 = vpack.i.bf16 %v953_v49, %v950_v48  ;;  %v996_v53 = vpack.c.bf16 %v953_v49, %v950_v48  ;;  %v1636_v54 = vpack.i.bf16 %v953_v49, %v940_v44  ;;  %v1618_v55 = vpop.permute.xlu1 %1617 }
 0x9cf   : > { %v1620_v58 = vunpack.i.h.bf16 %v1618_v55  ;;  %v1619_v59 = vunpack.i.l.bf16 %v1618_v55 }
 0x9d0   : > { %1632 = vrot.lane.b32.xlu1 %v1631_v50, %s1769_s9  ;;  %1622 = vrot.lane.b32.xlu0 %v1621_v51, %s1759_s12 }
 0x9d1   : > { %v973_v4 = vsel %vm972_vm13, %v1619_v59, %v1620_v58 }
 0x9d4   : > { %1627 = vrot.lane.b32.xlu0 %v1626_v52, %s1768_s8  ;;  %1023 = vrot.lane.b32.xlu1 %v996_v53, %s1770_s10 }
 0x9d8   : > { %1637 = vrot.lane.b32.xlu0 %v1636_v54, %s1769_s9  ;;  %s1771_s9 = smov 116  }
 0xa42   : > { %v1623_v11 = vpop.permute.xlu0 %1622  ;;  %v1633_v62 = vpop.permute.xlu1 %1632 }
 0xa43   : > { %v1625_v56 = vunpack.i.h.bf16 %v1623_v11  ;;  %v1624_v57 = vunpack.i.l.bf16 %v1623_v11  ;;  %v1635_v5 = vunpack.i.h.bf16 %v1633_v62  ;;  %v1634_v7 = vunpack.i.l.bf16 %v1633_v62 }
 0xa45   : > { %v958_v60 = vsel %vm286_vm4, %v1624_v57, %v1614_v47  ;;  %v959_v61 = vsel %vm286_vm4, %v1625_v56, %v1615_v46  ;;  %v990_v17 = vsel %vm989_vm14, %v1634_v7, %v1635_v5 }
 0xa46   : > { %v1628_v12 = vpop.permute.xlu0 %1627  ;;  %v997_v63 = vpack.c.bf16 %v959_v61, %v958_v60  ;;  %v1024_v23 = vpop.permute.xlu1 %1023 }
 0xa47   : > { %v1630_v2 = vunpack.i.h.bf16 %v1628_v12  ;;  %v1629_v3 = vunpack.i.l.bf16 %v1628_v12 }
 0xa48   : > { %1025 = vrot.lane.b32.xlu0 %v997_v63, %s1770_s10 }
 0xa49   : > { %v998_v8 = vpack.c.bf16 %v1629_v3, %v1619_v59  ;;  %v974_v9 = vsel %vm972_vm13, %v1629_v3, %v1630_v2 }
 0xa4a   : > { %v1638_v10 = vpop.permute.xlu0 %1637  ;;  %v999_v13 = vpack.c.bf16 %v974_v9, %v973_v4 }
 0xa4b   : > { %v1640_v14 = vunpack.i.h.bf16 %v1638_v10  ;;  %v1639_v15 = vunpack.i.l.bf16 %v1638_v10  ;;  %1027 = vrot.lane.b32.xlu1 %v998_v8, %s1770_s10 }
 0xa4c   : > { %1029 = vrot.lane.b32.xlu0 %v999_v13, %s1770_s10 }
 0xa4d   : > { %v1000_v16 = vpack.c.bf16 %v1639_v15, %v1634_v7  ;;  %v991_v18 = vsel %vm989_vm14, %v1639_v15, %v1640_v14 }
 0xa4e   : > { %v1001_v19 = vpack.c.bf16 %v991_v18, %v990_v17 }
 0xa4f   : > { %1031 = vrot.lane.b32.xlu1 %v1000_v16, %s1770_s10 }
 0xa50   : > { %1033 = vrot.lane.b32.xlu0 %v1001_v19, %s1770_s10 }
 0xa53   : > { %1004 = vperm.xlu1 %1520, %v1402_v20  }
 0xa54   : > { %1009 = vperm.xlu0 %1519, %v1403_v21  }
 0xaba   : > { %v1026_v25 = vpop.permute.xlu0 %1025 }
 0xabb   : > { %v1036_v27 = vsel %vm1035_vm15, %v1024_v23, %v1026_v25  ;;  %1048 = vmatprep.subr.bf16.mxu0 %v1026_v25  ;;  %v1408_v25 = vld [vmem:[%s2202_s4 + $0x20] sm:$0xff] }
 0xabc   : > { %1049 = vmatpush1.bf16.msra.mxu0 %v1036_v27  ;;  %v1409_v27 = vld [vmem:[%s2202_s4 + $0x28] sm:$0xff] }
 0xabd   : > { %v1028_v28 = vpop.permute.xlu1 %1027 }
 0xabe   : > { %v1030_v29 = vpop.permute.xlu0 %1029 }
 0xabf   : > { %v1037_v30 = vsel %vm1035_vm15, %v1028_v28, %v1030_v29  ;;  %1050 = vmatprep.subr.bf16.mxu0 %v1030_v29 }
 0xac0   : > { %1051 = vmatpush1.bf16.msra.mxu0 %v1037_v30 }
 0xac1   : > { %v1032_v0 = vpop.permute.xlu1 %1031 }
 0xac2   : > { %v1034_v31 = vpop.permute.xlu0 %1033 }
 0xac3   : > { %v1038_v1 = vsel %vm1035_vm15, %v1032_v0, %v1034_v31  ;;  %1052 = vmatprep.subr.bf16.mxu0 %v1034_v31 }
 0xac4   : > { %1053 = vmatpush1.bf16.msra.mxu0 %v1038_v1 }
 0xac7   : > { %1405 = vmatmul.mubr.msk.bf16.vlgmr.msra.gmra.mrb[8].mxu0 %vm384_vm8, %v1675_v32 }
 0xad2   : > { %v1005_v33 = vpop.permute.xlu1 %1004 }
 0xad3   : > { %v1010_v37 = vpop.permute.xlu0 %1009 }
 0xb9a   : > { %v1082_v34 = vpop.f32.mrb[8].mxu0 }
 0xb9b   : > { %v1083_v35 = vadd.f32 %v1082_v34, %v1005_v33  ;;  %v1084_v36 = vpop.f32.mrb[9].mxu0 }
 0xb9c   : > { %v1086_v39 = vpop.f32.mrb[10].mxu0  ;;  %v1677_v36 = vld [vmem:[%s1865_s11 + $0x8] sm:$0xff] }
 0xb9d   : > { %v1091_v40 = vsel %vm1927_vm11, %v1083_v35, 0.0  ;;  %v1087_v42 = vadd.f32 %v1086_v39, %v1010_v37  ;;  %v1088_v43 = vpop.f32.mrb[11].mxu0  ;;  %v1676_v35 = vld [vmem:[%s2201_s3 + $0x10] sm:$0xff]   ;;  %v1678_v37 = vld [vmem:[%s1865_s11 + $0x18] sm:$0xff]  ;;  %s239_s11 = sand.u32 1, %s1741_s19  }
 0xb9e   : > { %v1099_v44 = vmul.f32 0.1, %v1091_v40  ;;  %vm1095_vm0 = vcmp.gt.f32.partialorder %v1091_v40, 0.0  ;;  %s1381_s10 = sshll.u32 %s239_s11, 4 }
 0xb9f   : > { %v1093_v24 = vsel %vm1927_vm11, %v1087_v42, 0.0  ;;  %s241_s16 = scalar_lea.vmem [#allocation2], %s1381_s10 }
 0xba0   : > { %vm1097_vm1 = vcmp.gt.f32.partialorder %v1093_v24, 0.0  ;;  %v1101_v45 = vmul.f32 0.1, %v1093_v24  ;;  %v1103_v26 = vsel %vm1095_vm0, %v1091_v40, %v1099_v44  ;;  %s1295_s17 = sshll.u32 %s241_s16, 4  ;;  %s2145_s17 = int_to_ptr.vmem [resolvable:$true] %s1295_s17 }
 0xba1   : > { %v1646_v48 = vpack.i.bf16 %v1764_v22, %v1103_v26 }
 0xba2   : > { %v1105_v46 = vsel %vm1097_vm1, %v1093_v24, %v1101_v45 }
 0xba3   : > { %v1641_v47 = vpack.i.bf16 %v1105_v46, %v1103_v26  ;;  %v1656_v11 = vpack.i.bf16 %v1764_v22, %v1105_v46 }
 0xba5   : > { %1642 = vrot.lane.b32.xlu1 %v1641_v47, %s1759_s12 }
 0xba9   : > { %1647 = vrot.lane.b32.xlu1 %v1646_v48, %s1760_s13 }
 0xc17   : > { %v1643_v49 = vpop.permute.xlu1 %1642 }
 0xc18   : > { %v1645_v50 = vunpack.i.h.bf16 %v1643_v49  ;;  %v1644_v51 = vunpack.i.l.bf16 %v1643_v49 }
 0xc1a   : > { %v1118_v52 = vsel %vm286_vm4, %v1645_v50, 0.0  ;;  %v1115_v53 = vsel %vm286_vm4, %v1644_v51, 0.0 }
 0xc1b   : > { %v1661_v54 = vpack.i.bf16 %v1115_v53, %v1103_v26  ;;  %v1651_v55 = vpack.i.bf16 %v1118_v52, %v1115_v53  ;;  %v1159_v56 = vpack.c.bf16 %v1118_v52, %v1115_v53  ;;  %v1666_v57 = vpack.i.bf16 %v1118_v52, %v1105_v46  ;;  %v1648_v58 = vpop.permute.xlu1 %1647 }
 0xc1c   : > { %v1650_v62 = vunpack.i.h.bf16 %v1648_v58  ;;  %v1649_v12 = vunpack.i.l.bf16 %v1648_v58 }
 0xc1d   : > { %1662 = vrot.lane.b32.xlu1 %v1661_v54, %s1761_s14  ;;  %1652 = vrot.lane.b32.xlu0 %v1651_v55, %s1759_s12  ;;  %s2152_s12 = scalar_lea.sflag [#allocation3], %s239_s11 }
 0xc1e   : > { %v1137_v8 = vsel %vm311_vm5, %v1649_v12, %v1650_v62 }
 0xc21   : > { %1657 = vrot.lane.b32.xlu0 %v1656_v11, %s1760_s13  ;;  %1186 = vrot.lane.b32.xlu1 %v1159_v56, %s1762_s15  ;;  %s1679_s13 = scalar_lea.vmem %s2145_s17, 256 }
 0xc22   : > { %p1680_p12 = scmp.ne.s32.totalorder %s2145_s17, %s1679_s13 }
 0xc24   : > { %p1681_p13 = pnand %p1680_p12, %p1845_p4 }
 0xc25   : > { %1667 = vrot.lane.b32.xlu0 %v1666_v57, %s1761_s14  ;;  %s1683_s14 = sshll.u32 %s1772_s21, 4  ;;  %s1684_s14 = int_to_ptr.vmem [resolvable:$false] %s1683_s14 }
 0xc26   : > { %p1682_p0 = pneg %p1681_p13  ;;  %s1685_s7 = scalar_lea.vmem %s1684_s14, 512 }
 0xc27   : > { %p1686_p1 = scmp.lt.s32.totalorder %s2145_s17, %s1684_s14  ;;  %p1687_p2 = scmp.lt.s32.totalorder %s1685_s7, %s1679_s13 }
 0xc29   : > { %p1688_p3 = por %p1687_p2, %p1686_p1 }
 0xc2b   : > { %p1689_p5 = pnand %p1688_p3, %p1682_p0 }
 0xc8f   : > { %v1653_v59 = vpop.permute.xlu0 %1652  ;;  %v1663_v3 = vpop.permute.xlu1 %1662 }
 0xc90   : > { %v1655_v60 = vunpack.i.h.bf16 %v1653_v59  ;;  %v1654_v61 = vunpack.i.l.bf16 %v1653_v59  ;;  %v1665_v9 = vunpack.i.h.bf16 %v1663_v3  ;;  %v1664_v10 = vunpack.i.l.bf16 %v1663_v3 }
 0xc92   : > { %v1123_v63 = vsel %vm286_vm4, %v1654_v61, %v1644_v51  ;;  %v1124_v2 = vsel %vm286_vm4, %v1655_v60, %v1645_v50  ;;  %v1153_v20 = vsel %vm328_vm6, %v1664_v10, %v1665_v9  ;;  %vm1273_vm4 = vcmask 949248  }
 0xc93   : > { %v1658_v22 = vpop.permute.xlu0 %1657  ;;  %v1160_v4 = vpack.c.bf16 %v1124_v2, %v1123_v63  ;;  %v1187_v28 = vpop.permute.xlu1 %1186 }
 0xc94   : > { %v1660_v5 = vunpack.i.h.bf16 %v1658_v22  ;;  %v1659_v7 = vunpack.i.l.bf16 %v1658_v22 }
 0xc95   : > { %1188 = vrot.lane.b32.xlu0 %v1160_v4, %s1762_s15 }
 0xc96   : > { %v1161_v13 = vpack.c.bf16 %v1659_v7, %v1649_v12  ;;  %v1138_v14 = vsel %vm311_vm5, %v1659_v7, %v1660_v5 }
 0xc97   : > { %v1668_v15 = vpop.permute.xlu0 %1667  ;;  %v1162_v16 = vpack.c.bf16 %v1138_v14, %v1137_v8 }
 0xc98   : > { %v1670_v17 = vunpack.i.h.bf16 %v1668_v15  ;;  %v1669_v18 = vunpack.i.l.bf16 %v1668_v15  ;;  %1190 = vrot.lane.b32.xlu1 %v1161_v13, %s1762_s15 }
 0xc99   : > { %1192 = vrot.lane.b32.xlu0 %v1162_v16, %s1762_s15 }
 0xc9a   : > { %v1163_v19 = vpack.c.bf16 %v1669_v18, %v1664_v10  ;;  %v1154_v21 = vsel %vm328_vm6, %v1669_v18, %v1670_v17 }
 0xc9b   : > { %v1164_v23 = vpack.c.bf16 %v1154_v21, %v1153_v20 }
 0xc9c   : > { %1194 = vrot.lane.b32.xlu1 %v1163_v19, %s1762_s15 }
 0xc9d   : > { %1196 = vrot.lane.b32.xlu0 %v1164_v23, %s1762_s15 }
 0xca0   : > { %1167 = vperm.xlu1 %1520, %v1408_v25  }
 0xca1   : > { %1172 = vperm.xlu0 %1519, %v1409_v27  }
 0xca5   : > { %1267 = vrot.lane.b32.xlu0 %v1677_v36, %s1771_s9 }
 0xca9   : > { %1271 = vrot.lane.b32.xlu0 %v1678_v37, %s1771_s9 }
 0xd07   : > { %v1189_v29 = vpop.permute.xlu0 %1188 }
 0xd08   : > { %v1198_v30 = vsel %vm374_vm7, %v1187_v28, %v1189_v29  ;;  %1210 = vmatprep.subr.bf16.mxu1 %v1189_v29 }
 0xd09   : > { %1211 = vmatpush1.bf16.msra.mxu1 %v1198_v30 }
 0xd0a   : > { %v1191_v0 = vpop.permute.xlu1 %1190 }
 0xd0b   : > { %v1193_v31 = vpop.permute.xlu0 %1192 }
 0xd0c   : > { %v1199_v1 = vsel %vm374_vm7, %v1191_v0, %v1193_v31  ;;  %1212 = vmatprep.subr.bf16.mxu1 %v1193_v31 }
 0xd0d   : > { %1213 = vmatpush1.bf16.msra.mxu1 %v1199_v1 }
 0xd0e   : > { %v1195_v32 = vpop.permute.xlu1 %1194 }
 0xd0f   : > { %v1197_v33 = vpop.permute.xlu0 %1196 }
 0xd10   : > { %v1200_v34 = vsel %vm374_vm7, %v1195_v32, %v1197_v33  ;;  %1214 = vmatprep.subr.bf16.mxu1 %v1197_v33 }
 0xd11   : > { %1215 = vmatpush1.bf16.msra.mxu1 %v1200_v34 }
 0xd14   : > { %1411 = vmatmul.mubr.msk.bf16.vlgmr.msra.gmra.mrb[8].mxu1 %vm384_vm8, %v1676_v35 }
 0xd1f   : > { %v1168_v39 = vpop.permute.xlu1 %1167 }
 0xd20   : > { %v1173_v44 = vpop.permute.xlu0 %1172 }
 0xd24   : > { %v1268_v50 = vpop.permute.xlu0 %1267 }
 0xd28   : > { %v1272_v53 = vpop.permute.xlu0 %1271 }
 0xde7   : > { %v1244_v40 = vpop.f32.mrb[8].mxu1 }
 0xde8   : > { %v1245_v42 = vadd.f32 %v1244_v40, %v1168_v39  ;;  %v1246_v43 = vpop.f32.mrb[9].mxu1 }
 0xde9   : > { %v1248_v24 = vpop.f32.mrb[10].mxu1 }
 0xdea   : > { %v1253_v45 = vsel %vm1927_vm11, %v1245_v42, 0.0  ;;  %v1249_v26 = vadd.f32 %v1248_v24, %v1173_v44  ;;  %v1250_v46 = vpop.f32.mrb[11].mxu1 }
 0xdeb   : > { %v1257_v47 = vadd.f32 %v1253_v45, %v2057_v38 }
 0xdec   : > { %v1255_v48 = vsel %vm1927_vm11, %v1249_v26, 0.0 }
 0xded   : > { %1265 = vrot.lane.b32.xlu1 %v1257_v47, %s1771_s9  ;;  %v1259_v49 = vadd.f32 %v1255_v48, %v2062_v41 }
 0xdf1   : > { %1269 = vrot.lane.b32.xlu1 %v1259_v49, %s1771_s9 }
 0xe5f   : > { %v1266_v51 = vpop.permute.xlu1 %1265 }
 0xe60   : > { %v1274_v52 = vsel %vm1273_vm4, %v1266_v51, %v1268_v50 }
 0xe61   : > { %1278 = vst [vmem:[%s241_s16] sm:$0xff] %v1274_v52 }
 0xe63   : > { %v1270_v6 = vpop.permute.xlu1 %1269 }
 0xe64   : > { %v1275_v38 = vsel %vm1273_vm4, %v1270_v6, %v1272_v53 }
 0xe65   : > { %1279 = vst [vmem:[%s241_s16 + $0x8] sm:$0xff] %v1275_v38 }
 0xe66   : > { %1692 = shalt.err (!%p1689_p5)
}
 0xe67   : > { %s1693_s15 = scalar_lea.hbm %s2150_s29, 256  ;;  %s1697_s11 = scalar_lea.hbm %s2203_s5, 512 }
 0xe68   : > { %p1694_p6 = scmp.ne.s32.totalorder %s2150_s29, %s1693_s15  ;;  %p1698_p10 = scmp.lt.u32.totalorder %s2150_s29, %s2203_s5 }
 0xe69   : > { %p1699_p11 = scmp.lt.u32.totalorder %s1697_s11, %s1693_s15  ;;  %p1701_p13 = scmp.lt.u32.totalorder %s1693_s15, %s2150_s29 }
 0xe6a   : > { %p1695_p7 = pnand %p1694_p6, %p1845_p4 }
 0xe6b   : > { %p1700_p12 = por %p1699_p11, %p1698_p10 }
 0xe6c   : > { %p1696_p9 = pneg %p1695_p7 }
 0xe6d   : > { %p1702_p0 = por %p1701_p13, %p1700_p12 }
 0xe6f   : > { %p1703_p1 = pnand %p1702_p0, %p1696_p9 }
 0xe71   : > { %1706 = shalt.err (!%p1703_p1)
}
 0xe72   : > { %s1773_s24 = smov 128   ;;  %s1774_s25 = smov 8  }
 0xe73   : > { %1419 = dma.vmem_to_hbm [thread:$0]  (%p1845_p4), %s2145_s17, 256, %s2150_s29, %s2152_s12, %s1773_s24, %s1773_s24, %s1774_s25  }
 0xe74 PF: > { %p1425_p2 = scmp.ge.s32.totalorder %s1757_s23, 2  ;;  %s1310_s27 = sand.u32 1, %s1737_s18  }
 0xe75   : > { %s1311_s13 = scalar_lea.sflag [#allocation3], %s1310_s27 }
 0xe76   : > { %p1422_p3 = pnand %p1425_p2, %p1852_p8 }
 0xe78   : > { %1732 = dma.done.wait (!%p1422_p3), %s1311_s13, 256  }
 0xe79   : > { %1734 = vsyncadd (!%p1422_p3), %s1311_s13, 4294967040  ;;  %s18_s23 = sadd.s32 1, %s1757_s23   ;;  %s2208_s18 = smov %s1741_s19 }
 0xe7a   : > { %p15_p5 = scmp.ge.s32.totalorder %s18_s23, 4   ;;  %s2209_s19 = smov %s1745_s20 }
 0xe7b   : > { %s2210_s20 = smov %s1858_s6  ;;  %s2211_s21 = smov %s1753_s22 }
 0xe7c   : > { %s2212_s22 = smov %s2214_s26  ;;  %17 = sbr.rel (!%p15_p5) target bundleno = 4 (0x4), region = 83 }
 0xe83   :  { %1316 = vsyncpa [#allocation3], 1 }
 0xe84   :  { %1318 = vsyncpa [#allocation3 + $0x1], 1 }

</bundles_post_ra>
